<compile_context>
chip_gen: v5e
topology: v5e:2x2
jax: 0.10.0
libtpu: 0.0.40
codegen_flags: <defaults>
</compile_context>

<pallas_src>
import functools

import jax
import jax.numpy as jnp
from jax import lax
from jax.experimental import pallas as pl
from jax.experimental.pallas import tpu as pltpu

LANE = 128

# Dense component-major (3, tile_m, 128) path: block = 3*tile_m*128*4 bytes.
MAX_TILE_M = 2048            # 3 MiB block; double-buffered in+out = 12 MiB.
MAX_TILE_M_INTEGRATE = 1024  # leave VMEM headroom for fori_loop carries.
# Ragged component-major (3, tile_n) path: VMEM pads 3 -> 8 sublanes, so cap
# lower (padded footprint 2 MiB/buffer -> 8 MiB double-buffered, v5e-safe).
MAX_TILE_N = 512 * LANE
# PyTorch-layout (tile_b, 3) path.
MAX_TILE_B = 2048


def _l63_deriv(x0, x1, x2, sig, rho, beta):
    return (sig * (x1 - x0),
            x0 * (rho - x2) - x1,
            x0 * x1 - beta * x2)


def _l63_kernel(x_ref, o_ref, *, sig, rho, beta):
    # Works for both component-major block layouts:
    #   (3, tile_m, 128): rows are dense (1, tile_m, 128) slabs (full vregs).
    #   (3, tile_n):      rows are (1, tile_n) lane vectors (HBM-bound anyway).
    d0, d1, d2 = _l63_deriv(x_ref[0:1], x_ref[1:2], x_ref[2:3], sig, rho, beta)
    o_ref[0:1] = d0
    o_ref[1:2] = d1
    o_ref[2:3] = d2


def _l63_euler_kernel(x_ref, o_ref, *, sig, rho, beta, dt, num_steps):
    # Fused K-step explicit Euler: state stays in vregs/VMEM between steps, so
    # HBM traffic is one read + one write per K steps.
    def body(_, carry):
        a, b, c = carry
        da, db, dc = _l63_deriv(a, b, c, sig, rho, beta)
        return (a + dt * da, b + dt * db, c + dt * dc)

    a, b, c = lax.fori_loop(0, num_steps, body,
                            (x_ref[0:1], x_ref[1:2], x_ref[2:3]))
    o_ref[0:1] = a
    o_ref[1:2] = b
    o_ref[2:3] = c


def _l63_rowmajor_kernel(x_ref, o_ref, *, sig, rho, beta):
    # Direct PyTorch layout: block (tile_b, 3). Avoids boundary transposes.
    x = x_ref[...]
    d0, d1, d2 = _l63_deriv(x[:, 0:1], x[:, 1:2], x[:, 2:3], sig, rho, beta)
    o_ref[:, 0:1] = d0
    o_ref[:, 1:2] = d1
    o_ref[:, 2:3] = d2


def _dense_tile_m(m, max_tile):
    """Sublane tile keeping >=2 grid steps when possible (v7x has 2 TCs)."""
    if m < 16:
        return m  # single full-extent block
    steps = max(2, pl.cdiv(m, max_tile))
    return min(max_tile, ((pl.cdiv(m, steps) + 7) // 8) * 8)


def _run_dense(kernel, xs, tile_m, *, alias_state=False):
    """xs: (3, m, 128) -> same shape, tiled along the m (sublane) axis."""
    _, m, _ = xs.shape
    kwargs = {}
    if alias_state:
        kwargs["input_output_aliases"] = {0: 0}
    return pl.pallas_call(
        kernel,
        out_shape=jax.ShapeDtypeStruct(xs.shape, xs.dtype),
        grid=(pl.cdiv(m, tile_m),),
        in_specs=[pl.BlockSpec((3, tile_m, LANE), lambda i: (0, i, 0))],
        out_specs=pl.BlockSpec((3, tile_m, LANE), lambda i: (0, i, 0)),
        compiler_params=pltpu.CompilerParams(
            dimension_semantics=("parallel",)),
        **kwargs,
    )(xs)


def _run_ragged(kernel, x_cm, tile_n):
    """x_cm: (3, n) with n not 128-aligned; Pallas masks the ragged block."""
    _, n = x_cm.shape
    return pl.pallas_call(
        kernel,
        out_shape=jax.ShapeDtypeStruct((3, n), x_cm.dtype),
        grid=(pl.cdiv(n, tile_n),),
        in_specs=[pl.BlockSpec((3, tile_n), lambda i: (0, i))],
        out_specs=pl.BlockSpec((3, tile_n), lambda i: (0, i)),
        compiler_params=pltpu.CompilerParams(
            dimension_semantics=("parallel",)),
    )(x_cm)


def _run_cm(kernel, x_cm):
    """Run an elementwise (3, N) -> (3, N) kernel without pad/slice passes."""
    three, n = x_cm.shape
    assert three == 3, x_cm.shape
    if n % LANE == 0:
        m = n // LANE
        xs = x_cm.reshape(3, m, LANE)  # contiguous => free reshape
        out = _run_dense(kernel, xs, _dense_tile_m(m, MAX_TILE_M))
        return out.reshape(3, n)
    # Unaligned N: tile the raw (3, N) array; no pad/slice HBM round trips.
    if n <= LANE:
        tile_n = n
    else:
        steps = max(2, pl.cdiv(n, MAX_TILE_N))
        tile_n = min(MAX_TILE_N, pl.cdiv(pl.cdiv(n, steps), LANE) * LANE)
    return _run_ragged(kernel, x_cm, tile_n)


def l63_forward_cm(t, x_cm, sig=10.0, rho=28.0, beta=8.0 / 3):
    """Component-major L63 derivative: (3, N) -> (3, N). No transposes."""
    del t  # unused, ODE interface convention
    kernel = functools.partial(_l63_kernel, sig=sig, rho=rho, beta=beta)
    return _run_cm(kernel, x_cm)


def l63_euler_step_cm(t, x_cm, dt, sig=10.0, rho=28.0, beta=8.0 / 3):
    """Single fused Euler step x + dt*f(x), component-major (3, N)."""
    del t
    kernel = functools.partial(_l63_euler_kernel, sig=sig, rho=rho, beta=beta,
                               dt=dt, num_steps=1)
    return _run_cm(kernel, x_cm)


def l63_euler_integrate_cm(t0, x_cm, dt, num_steps,
                           sig=10.0, rho=28.0, beta=8.0 / 3):
    """Run `num_steps` fused explicit-Euler steps in ONE pallas_call.

    State stays resident on-chip between steps; HBM is touched once on the way
    in and once on the way out. For unaligned N the one-time pad/slice is
    amortized over all steps (f(0)=0, so the pad region stays zero).
    """
    del t0
    three, n = x_cm.shape
    assert three == 3, x_cm.shape
    n_pad = pl.cdiv(n, LANE) * LANE
    x_in = x_cm if n_pad == n else jnp.pad(x_cm, ((0, 0), (0, n_pad - n)))
    m = n_pad // LANE
    xs = x_in.reshape(3, m, LANE)
    kernel = functools.partial(_l63_euler_kernel, sig=sig, rho=rho, beta=beta,
                               dt=dt, num_steps=num_steps)
    out = _run_dense(kernel, xs, _dense_tile_m(m, MAX_TILE_M_INTEGRATE),
                     alias_state=True)
    out = out.reshape(3, n_pad)
    if n_pad != n:
        out = out[:, :n]
    return out


def l63_forward(t, x, sig=10.0, rho=28.0, beta=8.0 / 3):
    """PyTorch-compatible L63.forward: x (B, 3) -> (B, 3).

    Operates directly on the row-major (B, 3) layout (no boundary transposes).
    For integration loops, keep state component-major and use the *_cm APIs.
    """
    del t
    b = x.shape[0]
    tile_b = b if b <= MAX_TILE_B else MAX_TILE_B
    kernel = functools.partial(_l63_rowmajor_kernel, sig=sig, rho=rho, beta=beta)
    return pl.pallas_call(
        kernel,
        out_shape=jax.ShapeDtypeStruct(x.shape, x.dtype),
        grid=(pl.cdiv(b, tile_b),),
        in_specs=[pl.BlockSpec((tile_b, 3), lambda i: (i, 0))],
        out_specs=pl.BlockSpec((tile_b, 3), lambda i: (i, 0)),
        compiler_params=pltpu.CompilerParams(
            dimension_semantics=("parallel",)),
    )(x)


class L63:
    """Drop-in analogue of the PyTorch L63 module (fe is a Python counter)."""

    def __init__(self):
        self.fe = 0

    def __call__(self, t, x, sig=10.0, rho=28.0, beta=8.0 / 3):
        self.fe += 1  # TODO(synk): Python-side counter, not a tensor op.
        return l63_forward(t, x, sig, rho, beta)


def _ref_deriv(x, sig=10.0, rho=28.0, beta=8.0 / 3):
    r0 = sig * (x[:, 1] - x[:, 0])
    r1 = x[:, 0] * (rho - x[:, 2]) - x[:, 1]
    r2 = x[:, 0] * x[:, 1] - beta * x[:, 2]
    return jnp.stack([r0, r1, r2], axis=1)


if __name__ == "__main__":
    key = jax.random.PRNGKey(0)
    k1, k2, k3 = jax.random.split(key, 3)

    # 1) PyTorch-layout path (matches the nn.Module interface), B = 8.
    B = 8
    x = jax.random.normal(k1, (B, 3), dtype=jnp.float32)
    model = L63()
    out = jax.block_until_ready(model(0.0, x))
    ref = _ref_deriv(x)
    assert out.shape == (B, 3), out.shape
    assert out.dtype == jnp.float32, out.dtype
    assert jnp.allclose(out, ref, atol=1e-5, rtol=1e-5)
    assert model.fe == 1

    # 2) Component-major path, unaligned N (ragged blocks, no pad/slice).
    N2 = 200
    x2 = jax.random.normal(k2, (3, N2), dtype=jnp.float32)
    ref2 = _ref_deriv(x2.T).T
    out2 = jax.block_until_ready(l63_forward_cm(0.0, x2))
    assert out2.shape == (3, N2), out2.shape
    assert jnp.allclose(out2, ref2, atol=1e-5, rtol=1e-5)

    # 3) Component-major path, 128-aligned N (dense (3, M, 128) layout).
    N3 = 256
    x3 = jax.random.normal(k3, (3, N3), dtype=jnp.float32)
    ref3 = _ref_deriv(x3.T).T
    out3 = jax.block_until_ready(l63_forward_cm(0.0, x3))
    assert out3.shape == (3, N3), out3.shape
    assert jnp.allclose(out3, ref3, atol=1e-5, rtol=1e-5)

    # 4) Single fused Euler step.
    dt = 0.01
    step = jax.block_until_ready(l63_euler_step_cm(0.0, x2, dt))
    assert jnp.allclose(step, x2 + dt * ref2, atol=1e-5, rtol=1e-5)

    # 5) Fused multi-step integration (one pallas_call, K steps) vs jnp loop.
    K = 5
    xt = x2
    for _ in range(K):
        xt = xt + dt * _ref_deriv(xt.T).T
    traj = jax.block_until_ready(l63_euler_integrate_cm(0.0, x2, dt, K))
    assert traj.shape == (3, N2), traj.shape
    assert jnp.allclose(traj, xt, atol=1e-4, rtol=1e-4)

    print("KERNEL_OK")
</pallas_src>

<mosaic_0001>
module attributes {stable_mosaic.version = 11 : i64} {
  func.func @_l63_rowmajor_kernel(%arg0: i32, %arg1: memref<8x3xf32, #tpu.memory_space<vmem>>, %arg2: memref<8x3xf32, #tpu.memory_space<vmem>>) attributes {dimension_semantics = [#tpu.dimension_semantics<parallel>], iteration_bounds = array<i64: 1>, scalar_prefetch = 0 : i64, scratch_operands = 0 : i64, tpu.core_type = #tpu.core_type<tc>, window_params = [{transform_indices = @transform_0, window_bounds = array<i64: 8, 3>}, {transform_indices = @transform_1, window_bounds = array<i64: 8, 3>}]} {
    %c0 = arith.constant 0 : index
    %c0_0 = arith.constant 0 : index
    %0 = vector.load %arg1[%c0, %c0_0] : memref<8x3xf32, #tpu.memory_space<vmem>>, vector<8x3xf32>
    %1 = vector.extract_strided_slice %0 {offsets = [0, 0], sizes = [8, 1], strides = [1, 1]} : vector<8x3xf32> to vector<8x1xf32>
    %2 = vector.extract_strided_slice %0 {offsets = [0, 1], sizes = [8, 1], strides = [1, 1]} : vector<8x3xf32> to vector<8x1xf32>
    %3 = vector.extract_strided_slice %0 {offsets = [0, 2], sizes = [8, 1], strides = [1, 1]} : vector<8x3xf32> to vector<8x1xf32>
    %4 = arith.subf %2, %1 : vector<8x1xf32>
    %cst = arith.constant 1.000000e+01 : f32
    %5 = vector.broadcast %cst : f32 to vector<8x1xf32>
    %6 = arith.mulf %5, %4 : vector<8x1xf32>
    %cst_1 = arith.constant 2.800000e+01 : f32
    %7 = vector.broadcast %cst_1 : f32 to vector<8x1xf32>
    %8 = arith.subf %7, %3 : vector<8x1xf32>
    %9 = arith.mulf %1, %8 : vector<8x1xf32>
    %10 = arith.subf %9, %2 : vector<8x1xf32>
    %11 = arith.mulf %1, %2 : vector<8x1xf32>
    %cst_2 = arith.constant 2.66666675 : f32
    %12 = vector.broadcast %cst_2 : f32 to vector<8x1xf32>
    %13 = arith.mulf %12, %3 : vector<8x1xf32>
    %14 = arith.subf %11, %13 : vector<8x1xf32>
    %c0_3 = arith.constant 0 : index
    %c0_4 = arith.constant 0 : index
    %15 = vector.load %arg2[%c0_3, %c0_4] : memref<8x3xf32, #tpu.memory_space<vmem>>, vector<8x1xf32>
    tpu.vector_store %arg2[%c0_3, %c0_4], %6 {strides = array<i32>} : memref<8x3xf32, #tpu.memory_space<vmem>>, vector<8x1xf32>,
    %c0_5 = arith.constant 0 : index
    %c1 = arith.constant 1 : index
    %16 = vector.load %arg2[%c0_5, %c1] : memref<8x3xf32, #tpu.memory_space<vmem>>, vector<8x1xf32>
    tpu.vector_store %arg2[%c0_5, %c1], %10 {strides = array<i32>} : memref<8x3xf32, #tpu.memory_space<vmem>>, vector<8x1xf32>,
    %c0_6 = arith.constant 0 : index
    %c2 = arith.constant 2 : index
    %17 = vector.load %arg2[%c0_6, %c2] : memref<8x3xf32, #tpu.memory_space<vmem>>, vector<8x1xf32>
    tpu.vector_store %arg2[%c0_6, %c2], %14 {strides = array<i32>} : memref<8x3xf32, #tpu.memory_space<vmem>>, vector<8x1xf32>,
    return
  }
  func.func @transform_0(%arg0: i32) -> (i32, i32) {
    %c0_i32 = arith.constant 0 : i32
    %c0_i32_0 = arith.constant 0 : i32
    return %arg0, %c0_i32 : i32, i32
  }
  func.func @transform_1(%arg0: i32) -> (i32, i32) {
    %c0_i32 = arith.constant 0 : i32
    %c0_i32_0 = arith.constant 0 : i32
    return %arg0, %c0_i32 : i32, i32
  }
}

</mosaic_0001>

<bundles_post_ra>
// kernel: tpu_custom_call.1
= control target key start
LH: loop header
LB: loop body
LE: loop exit
PB: predicated region body
PF: predicated region fallthrough
CT: control target
= control target key end

     0   :  { %s58_s8 = smov 127   ;;  %s59_s9 = smov 1   ;;  %vm36_vm0 = vcmask 7168   ;;  %vm42_vm1 = vcmask 15368   ;;  %vm48_vm2 = vcmask 23568   ;;  %s84_s0 = inlined_call_operand.vmem [shape: f32[8,3], index: 0, kind: input, shape index: {}]   ;;  %s85_s1 = inlined_call_operand.vmem [shape: f32[8,3], index: 1, kind: output, shape index: {}]  }
   0x1   :  { %v8_v0 = vld [vmem:[%s84_s0] sm:$0xff]  ;;  %s60_s10 = smov 126   ;;  %s61_s0 = smov 2  }
   0x2   :  { %21 = vrot.lane.b32.xlu1 %v8_v0, %s58_s8  ;;  %10 = vrot.lane.b32.xlu0 %v8_v0, %s59_s9  ;;  %v26_v1 = vmul.f32 2.6666667, %v8_v0  ;;  %v15_v2 = vsub.f32 28.0, %v8_v0 }
   0xa   :  { %28 = vrot.lane.b32.xlu1 %v26_v1, %s60_s10  ;;  %17 = vrot.lane.b32.xlu0 %v15_v2, %s60_s10 }
  0x74   :  { %v22_v3 = vpop.permute.xlu1 %21  ;;  %v11_v4 = vpop.permute.xlu0 %10 }
  0x75   :  { %v13_v5 = vsub.f32 %v8_v0, %v11_v4  ;;  %v25_v7 = vmul.f32 %v22_v3, %v8_v0 }
  0x77   :  { %v14_v6 = vmul.f32 10.0, %v13_v5 }
  0x79   :  { %33 = vrot.lane.b32.xlu2 %v14_v6, %s58_s8 }
  0x7c   :  { %v29_v8 = vpop.permute.xlu1 %28  ;;  %v18_v9 = vpop.permute.xlu0 %17 }
  0x7d   :  { %v31_v10 = vsub.f32 %v25_v7, %v29_v8  ;;  %v20_v11 = vmul.f32 %v18_v9, %v8_v0 }
  0x7f   :  { %v24_v12 = vsub.f32 %v20_v11, %v22_v3  ;;  %45 = vrot.lane.b32.xlu0 %v31_v10, %s61_s0 }
  0x81   :  { %39 = vrot.lane.b32.xlu2 %v24_v12, %s59_s9 }
  0xd3   :  { %v34_v13 = vpop.permute.xlu2 %33 }
  0xd4   :  { %37 = vst.msk [vmem:[%s85_s1] sm:$0xff] %vm36_vm0, %v34_v13 }
  0xdb   :  { %v40_v14 = vpop.permute.xlu2 %39 }
  0xdc   :  { %43 = vst.msk [vmem:[%s85_s1] sm:$0xff] %vm42_vm1, %v40_v14 }
  0xf1   :  { %v46_v15 = vpop.permute.xlu0 %45 }
  0xf2   :  { %49 = vst.msk [vmem:[%s85_s1] sm:$0xff] %vm48_vm2, %v46_v15 }

</bundles_post_ra>
